<compile_context>
chip_gen: v7x
topology: tpu7x:2x2x1
jax: 0.10.0
libtpu: 0.0.40
codegen_flags: <defaults>
</compile_context>

<pallas_src>
import jax
import jax.numpy as jnp
import numpy as np
from jax import lax
from jax.experimental import pallas as pl
from jax.experimental.pallas import tpu as pltpu

# ---------------------------------------------------------------------------
# Problem sizes (small, consistent with the module's __init__)
# ---------------------------------------------------------------------------
B = 4              # batch of graphs per pallas_call
N = 64             # number of graph nodes
F = 32             # FEATURE_SIZE (in_feats)
H = 32             # hidden_size
OUT = 16           # OUTPUT_SIZE
NUM_ATTN = 3       # len(conv_flow) + layer_dim_ex  (2 + 1)
O_PAD = 128        # lane-dense padded output width
H2 = 2 * H
H4 = 4 * H


# ---------------------------------------------------------------------------
# Pallas kernel: one graph per grid step, 4 MXU ops total
# ---------------------------------------------------------------------------
def scparalag_kernel(
    x_ref,      # (1, N, F)     bf16  node features of graph b
    a_ref,      # (1, 2N, N)    bf16  [A_hat ; A_mean] stacked row-wise
    wx_ref,     # (F, 4H)       bf16  [Wc1 | Wneigh | Wl1 | Wself+Wl2]
    bias_ref,   # (8, O_PAD)    f32   row0=[bc1+bl1|bs+bl2|0], row1=[br1|br2|0], row2=bf_pad
    wres_ref,   # (2H, 2H)      bf16  blockdiag(Wr1, Wr2)
    wf_ref,     # (2H, O_PAD)   bf16  [diag(w0)@Wf ; diag(w1)@Wf], lane-padded
    out_ref,    # (1, N, O_PAD) f32
):
    x = x_ref[0]                                                          # (N, F)  bf16
    a = a_ref[0]                                                          # (2N, N) bf16

    # ---- single lane-dense X-side projection --------------------------------
    xw = jnp.dot(x, wx_ref[...], preferred_element_type=jnp.float32)     # (N, 4H) f32
    # lanes 0:H   -> X @ Wc1          (feeds gconv aggregation)
    # lanes H:2H  -> X @ Wneigh       (feeds sage  aggregation)
    # lanes 2H:3H -> X @ Wl1          (linear 1)
    # lanes 3H:4H -> X @ (Wself+Wl2)  (sage self + linear 2)

    # ---- fused neighbor aggregation for both graph layers -------------------
    # rows 0:N  = A_hat  @ [XW1|XW2], rows N:2N = A_mean @ [XW1|XW2]
    agg = jnp.dot(a, xw[:, :H2].astype(jnp.bfloat16),
                  preferred_element_type=jnp.float32)                    # (2N, 2H) f32

    # keep the useful quadrants: (A_hat@X@Wc1) in lanes 0:H, (A_mean@X@Wneigh) in lanes H:2H
    lane = lax.broadcasted_iota(jnp.int32, (N, H2), 1)
    agg_sel = jnp.where(lane < H, agg[:N, :], agg[N:, :])                # (N, 2H)  f32

    bcat = bias_ref[0:1, :H2]      # [bc1+bl1 | bs+bl2]
    brcat = bias_ref[1:2, :H2]     # [br1 | br2]
    bfin = bias_ref[2:3, :]        # final bias, lane-padded

    # z1 | z2 side-by-side in one (N, 2H) tile
    zcat = agg_sel + xw[:, H2:] + bcat                                   # (N, 2H)  f32

    # ---- block-diagonal residual layers + relu (dropout = identity, eval) ---
    rcat = jnp.maximum(
        jnp.dot(zcat.astype(jnp.bfloat16), wres_ref[...],
                preferred_element_type=jnp.float32) + brcat, 0.0)        # (N, 2H)  f32

    # ---- LayerAttention folded into the final linear (lane-dense store) -----
    out_ref[0] = (
        jnp.dot(rcat.astype(jnp.bfloat16), wf_ref[...],
                preferred_element_type=jnp.float32) + bfin
    ).astype(out_ref.dtype)


# ---------------------------------------------------------------------------
# One-time parameter packing (hoisted out of the forward path)
# ---------------------------------------------------------------------------
def pack_params(p):
    bf16 = jnp.bfloat16
    # LayerAttention softmax over ALL 3 learned rows; only rows 0-1 are consumed
    # (matches the original module's zip() truncation).
    attn_sm = jax.nn.softmax(p["attn"], axis=0)
    w0, w1 = attn_sm[0], attn_sm[1]                                       # (H,)

    # X-side weight slab.
    wx = jnp.concatenate(
        [p["wc1"], p["wneigh"], p["wl1"], p["wself"] + p["wl2"]], axis=1
    ).astype(bf16)                                                        # (F, 4H)

    # All biases in one f32 slab (8 sublanes, 128 lanes).
    bias = jnp.zeros((8, O_PAD), jnp.float32)
    bias = bias.at[0, :H].set((p["bc1"] + p["bl1"])[0])
    bias = bias.at[0, H:H2].set((p["bs"] + p["bl2"])[0])
    bias = bias.at[1, :H].set(p["br1"][0])
    bias = bias.at[1, H:H2].set(p["br2"][0])
    bias = bias.at[2, :OUT].set(p["bf"][0])

    # Block-diagonal residual weights.
    wres = jnp.zeros((H2, H2), jnp.float32)
    wres = wres.at[:H, :H].set(p["wr1"]).at[H:, H:].set(p["wr2"]).astype(bf16)

    # Attention-folded, lane-padded final weight.
    wf = jnp.zeros((H2, O_PAD), jnp.float32)
    wf = wf.at[:H, :OUT].set(w0[:, None] * p["wf"])
    wf = wf.at[H:, :OUT].set(w1[:, None] * p["wf"])
    wf = wf.astype(bf16)

    return {"wx": wx, "bias": bias, "wres": wres, "wf": wf}


# ---------------------------------------------------------------------------
# Forward: one jitted pallas_call over a batch of graphs
# ---------------------------------------------------------------------------
@jax.jit
def scparalag_forward(x_b, a_b, packed):
    b = x_b.shape[0]
    x_b = x_b.astype(jnp.bfloat16)
    a_b = a_b.astype(jnp.bfloat16)

    grid_spec = pltpu.PrefetchScalarGridSpec(
        num_scalar_prefetch=0,
        grid=(b,),
        in_specs=[
            pl.BlockSpec((1, N, F), lambda i: (i, 0, 0)),        # per-graph features
            pl.BlockSpec((1, 2 * N, N), lambda i: (i, 0, 0)),    # per-graph [A_hat;A_mean]
            pl.BlockSpec((F, H4), lambda i: (0, 0)),             # grid-invariant weights
            pl.BlockSpec((8, O_PAD), lambda i: (0, 0)),
            pl.BlockSpec((H2, H2), lambda i: (0, 0)),
            pl.BlockSpec((H2, O_PAD), lambda i: (0, 0)),
        ],
        out_specs=pl.BlockSpec((1, N, O_PAD), lambda i: (i, 0, 0)),
    )

    out_pad = pl.pallas_call(
        scparalag_kernel,
        out_shape=jax.ShapeDtypeStruct((b, N, O_PAD), jnp.float32),
        grid_spec=grid_spec,
        compiler_params=pltpu.CompilerParams(dimension_semantics=("parallel",)),
    )(x_b, a_b, packed["wx"], packed["bias"], packed["wres"], packed["wf"])

    return out_pad[:, :, :OUT]


# ---------------------------------------------------------------------------
# References
# ---------------------------------------------------------------------------
def reference_forward_f32(x, ahat, amean, p):
    """Original-module math in float32 (semantic reference, one graph)."""
    conv1 = ahat @ (x @ p["wc1"]) + p["bc1"]
    lin1 = x @ p["wl1"] + p["bl1"]
    r1 = jax.nn.relu((conv1 + lin1) @ p["wr1"] + p["br1"])

    conv2 = x @ p["wself"] + (amean @ x) @ p["wneigh"] + p["bs"]
    lin2 = x @ p["wl2"] + p["bl2"]
    r2 = jax.nn.relu((conv2 + lin2) @ p["wr2"] + p["br2"])

    w = jax.nn.softmax(p["attn"], axis=0)
    h = w[0] * r1 + w[1] * r2
    return h @ p["wf"] + p["bf"]


def reference_forward_packed(x, a_stack, packed):
    """Precision-matched reference mirroring the kernel ops (bf16 MXU / f32 accumulate)."""
    bf16 = jnp.bfloat16
    xw = jnp.dot(x.astype(bf16), packed["wx"], preferred_element_type=jnp.float32)
    agg = jnp.dot(a_stack.astype(bf16), xw[:, :H2].astype(bf16),
                  preferred_element_type=jnp.float32)
    lane = np.arange(H2)[None, :]
    agg_sel = jnp.where(lane < H, agg[:N, :], agg[N:, :])
    zcat = agg_sel + xw[:, H2:] + packed["bias"][0:1, :H2]
    rcat = jnp.maximum(
        jnp.dot(zcat.astype(bf16), packed["wres"], preferred_element_type=jnp.float32)
        + packed["bias"][1:2, :H2], 0.0)
    out = jnp.dot(rcat.astype(bf16), packed["wf"],
                  preferred_element_type=jnp.float32) + packed["bias"][2:3, :]
    return out[:, :OUT]


# ---------------------------------------------------------------------------
# Deterministic parameter / input construction
# ---------------------------------------------------------------------------
def make_params(key):
    keys = jax.random.split(key, 16)

    def kaiming(k, shape):
        fan_in = shape[0]
        return (jax.random.normal(k, shape, jnp.float32) * np.sqrt(2.0 / fan_in)).astype(
            jnp.float32)

    return {
        "wc1": kaiming(keys[0], (F, H)),
        "bc1": jnp.zeros((1, H), jnp.float32),
        "wl1": kaiming(keys[1], (F, H)),
        "bl1": 0.01 * jax.random.normal(keys[2], (1, H), jnp.float32),
        "wr1": kaiming(keys[3], (H, H)),
        "br1": 0.01 * jax.random.normal(keys[4], (1, H), jnp.float32),
        "wself": kaiming(keys[5], (F, H)),
        "wneigh": kaiming(keys[6], (F, H)),
        "bs": jnp.zeros((1, H), jnp.float32),
        "wl2": kaiming(keys[7], (F, H)),
        "bl2": 0.01 * jax.random.normal(keys[8], (1, H), jnp.float32),
        "wr2": kaiming(keys[9], (H, H)),
        "br2": 0.01 * jax.random.normal(keys[10], (1, H), jnp.float32),
        "attn": kaiming(keys[11], (NUM_ATTN, H)),
        "wf": kaiming(keys[12], (H, OUT)),
        "bf": 0.01 * jax.random.normal(keys[13], (1, OUT), jnp.float32),
    }


def make_graph(key, n):
    # deterministic symmetric graph: ring + a few random edges, no self loops
    a = np.zeros((n, n), np.float32)
    idx = np.arange(n)
    a[idx, (idx + 1) % n] = 1.0
    a[(idx + 1) % n, idx] = 1.0
    extra = np.asarray(jax.random.randint(key, (2 * n, 2), 0, n))
    for i, j in extra:
        if i != j:
            a[i, j] = 1.0
            a[j, i] = 1.0
    deg = a.sum(axis=1)
    d_inv_sqrt = 1.0 / np.sqrt(deg)
    d_inv = 1.0 / deg
    ahat = (d_inv_sqrt[:, None] * a) * d_inv_sqrt[None, :]   # GraphConv 'both' norm
    amean = d_inv[:, None] * a                               # SAGE 'mean' aggregation
    return jnp.asarray(ahat), jnp.asarray(amean)


if __name__ == "__main__":
    key = jax.random.PRNGKey(0)
    k_x, k_g, k_p = jax.random.split(key, 3)

    params = make_params(k_p)
    packed = pack_params(params)        # one-time packing, NOT on the forward path

    gkeys = jax.random.split(k_g, B)
    xkeys = jax.random.split(k_x, B)
    xs, ahats, ameans, astacks = [], [], [], []
    for b in range(B):
        ah, am = make_graph(gkeys[b], N)
        ahats.append(ah)
        ameans.append(am)
        astacks.append(jnp.concatenate([ah, am], axis=0))    # (2N, N), fixed per graph
        xs.append(jax.random.normal(xkeys[b], (N, F), jnp.float32))

    x_b = jnp.stack(xs)          # (B, N, F)
    a_b = jnp.stack(astacks)     # (B, 2N, N)

    out = scparalag_forward(x_b, a_b, packed)
    out = jax.block_until_ready(out)
    out_np = np.asarray(out)

    for b in range(B):
        # Tight check vs. a precision-matched (bf16 MXU / f32 accumulate) packed reference.
        ref_p = np.asarray(reference_forward_packed(xs[b], astacks[b], packed))
        np.testing.assert_allclose(out_np[b], ref_p, rtol=2e-3, atol=2e-3)
        # Loose check vs. the original f32 module math (deviation bounded by bf16 rounding).
        ref_f = np.asarray(reference_forward_f32(xs[b], ahats[b], ameans[b], params))
        np.testing.assert_allclose(out_np[b], ref_f, rtol=1e-1, atol=1e-1)

    print("KERNEL_OK")
</pallas_src>

<mosaic_0001>
module attributes {stable_mosaic.version = 11 : i64} {
  func.func @scparalag_kernel(%arg0: i32, %arg1: memref<1x64x32xbf16, #tpu.memory_space<vmem>>, %arg2: memref<1x128x64xbf16, #tpu.memory_space<vmem>>, %arg3: memref<32x128xbf16, #tpu.memory_space<vmem>>, %arg4: memref<8x128xf32, #tpu.memory_space<vmem>>, %arg5: memref<64x64xbf16, #tpu.memory_space<vmem>>, %arg6: memref<64x128xbf16, #tpu.memory_space<vmem>>, %arg7: memref<1x64x128xf32, #tpu.memory_space<vmem>>) attributes {dimension_semantics = [#tpu.dimension_semantics<parallel>], iteration_bounds = array<i64: 4>, scalar_prefetch = 0 : i64, scratch_operands = 0 : i64, tpu.core_type = #tpu.core_type<tc>, window_params = [{transform_indices = @transform_0, window_bounds = array<i64: 1, 64, 32>}, {transform_indices = @transform_1, window_bounds = array<i64: 1, 128, 64>}, {pipeline_mode = #tpu.pipeline_mode<synchronous>, transform_indices = @transform_2, window_bounds = array<i64: 32, 128>}, {pipeline_mode = #tpu.pipeline_mode<synchronous>, transform_indices = @transform_3, window_bounds = array<i64: 8, 128>}, {pipeline_mode = #tpu.pipeline_mode<synchronous>, transform_indices = @transform_4, window_bounds = array<i64: 64, 64>}, {pipeline_mode = #tpu.pipeline_mode<synchronous>, transform_indices = @transform_5, window_bounds = array<i64: 64, 128>}, {transform_indices = @transform_6, window_bounds = array<i64: 1, 64, 128>}]} {
    %c0 = arith.constant 0 : index
    %c0_0 = arith.constant 0 : index
    %c0_1 = arith.constant 0 : index
    %0 = vector.load %arg1[%c0, %c0_0, %c0_1] : memref<1x64x32xbf16, #tpu.memory_space<vmem>>, vector<1x64x32xbf16>
    %1 = vector.shape_cast %0 : vector<1x64x32xbf16> to vector<64x32xbf16>
    %c0_2 = arith.constant 0 : index
    %c0_3 = arith.constant 0 : index
    %c0_4 = arith.constant 0 : index
    %2 = vector.load %arg2[%c0_2, %c0_3, %c0_4] : memref<1x128x64xbf16, #tpu.memory_space<vmem>>, vector<1x128x64xbf16>
    %3 = vector.shape_cast %2 : vector<1x128x64xbf16> to vector<128x64xbf16>
    %c0_5 = arith.constant 0 : index
    %c0_6 = arith.constant 0 : index
    %4 = vector.load %arg3[%c0_5, %c0_6] : memref<32x128xbf16, #tpu.memory_space<vmem>>, vector<32x128xbf16>
    %cst = arith.constant dense<0.000000e+00> : vector<64x128xf32>
    %5 = tpu.matmul %1, %4, %cst {dimension_numbers = #tpu.dot_dimension_numbers<[1], [0], [0], [1], [0, 0, 1, 1], [], []>} : vector<64x32xbf16>, vector<32x128xbf16>, vector<64x128xf32> -> vector<64x128xf32>
    %6 = vector.extract_strided_slice %5 {offsets = [0, 0], sizes = [64, 64], strides = [1, 1]} : vector<64x128xf32> to vector<64x64xf32>
    %7 = arith.truncf %6 : vector<64x64xf32> to vector<64x64xbf16>
    %cst_7 = arith.constant dense<0.000000e+00> : vector<128x64xf32>
    %8 = tpu.matmul %3, %7, %cst_7 {dimension_numbers = #tpu.dot_dimension_numbers<[1], [0], [0], [1], [0, 0, 1, 1], [], []>} : vector<128x64xbf16>, vector<64x64xbf16>, vector<128x64xf32> -> vector<128x64xf32>
    %9 = tpu.iota {dimensions = array<i32: 1>} : vector<64x64xi32>
    %c32_i32 = arith.constant 32 : i32
    %10 = vector.broadcast %c32_i32 : i32 to vector<64x64xi32>
    %11 = arith.cmpi slt, %9, %10 : vector<64x64xi32>
    %12 = vector.extract_strided_slice %8 {offsets = [0, 0], sizes = [64, 64], strides = [1, 1]} : vector<128x64xf32> to vector<64x64xf32>
    %13 = vector.extract_strided_slice %8 {offsets = [64, 0], sizes = [64, 64], strides = [1, 1]} : vector<128x64xf32> to vector<64x64xf32>
    %14 = arith.select %11, %12, %13 : vector<64x64xi1>, vector<64x64xf32>
    %c0_8 = arith.constant 0 : index
    %c0_9 = arith.constant 0 : index
    %15 = vector.load %arg4[%c0_8, %c0_9] : memref<8x128xf32, #tpu.memory_space<vmem>>, vector<1x64xf32>
    %c1 = arith.constant 1 : index
    %c0_10 = arith.constant 0 : index
    %16 = vector.load %arg4[%c1, %c0_10] : memref<8x128xf32, #tpu.memory_space<vmem>>, vector<1x64xf32>
    %c2 = arith.constant 2 : index
    %c0_11 = arith.constant 0 : index
    %17 = vector.load %arg4[%c2, %c0_11] : memref<8x128xf32, #tpu.memory_space<vmem>>, vector<1x128xf32>
    %18 = vector.extract_strided_slice %5 {offsets = [0, 64], sizes = [64, 64], strides = [1, 1]} : vector<64x128xf32> to vector<64x64xf32>
    %19 = arith.addf %14, %18 : vector<64x64xf32>
    %20 = vector.broadcast %15 : vector<1x64xf32> to vector<64x64xf32>
    %21 = arith.addf %19, %20 : vector<64x64xf32>
    %22 = arith.truncf %21 : vector<64x64xf32> to vector<64x64xbf16>
    %c0_12 = arith.constant 0 : index
    %c0_13 = arith.constant 0 : index
    %23 = vector.load %arg5[%c0_12, %c0_13] : memref<64x64xbf16, #tpu.memory_space<vmem>>, vector<64x64xbf16>
    %cst_14 = arith.constant dense<0.000000e+00> : vector<64x64xf32>
    %24 = tpu.matmul %22, %23, %cst_14 {dimension_numbers = #tpu.dot_dimension_numbers<[1], [0], [0], [1], [0, 0, 1, 1], [], []>} : vector<64x64xbf16>, vector<64x64xbf16>, vector<64x64xf32> -> vector<64x64xf32>
    %25 = vector.broadcast %16 : vector<1x64xf32> to vector<64x64xf32>
    %26 = arith.addf %24, %25 : vector<64x64xf32>
    %cst_15 = arith.constant 0.000000e+00 : f32
    %27 = vector.broadcast %cst_15 : f32 to vector<64x64xf32>
    %28 = arith.maximumf %26, %27 : vector<64x64xf32>
    %29 = arith.truncf %28 : vector<64x64xf32> to vector<64x64xbf16>
    %c0_16 = arith.constant 0 : index
    %c0_17 = arith.constant 0 : index
    %30 = vector.load %arg6[%c0_16, %c0_17] : memref<64x128xbf16, #tpu.memory_space<vmem>>, vector<64x128xbf16>
    %cst_18 = arith.constant dense<0.000000e+00> : vector<64x128xf32>
    %31 = tpu.matmul %29, %30, %cst_18 {dimension_numbers = #tpu.dot_dimension_numbers<[1], [0], [0], [1], [0, 0, 1, 1], [], []>} : vector<64x64xbf16>, vector<64x128xbf16>, vector<64x128xf32> -> vector<64x128xf32>
    %32 = vector.broadcast %17 : vector<1x128xf32> to vector<64x128xf32>
    %33 = arith.addf %31, %32 : vector<64x128xf32>
    %c0_19 = arith.constant 0 : index
    %c0_20 = arith.constant 0 : index
    %c0_21 = arith.constant 0 : index
    %34 = vector.load %arg7[%c0_19, %c0_20, %c0_21] : memref<1x64x128xf32, #tpu.memory_space<vmem>>, vector<1x64x128xf32>
    %35 = vector.shape_cast %34 : vector<1x64x128xf32> to vector<64x128xf32>
    %36 = vector.shape_cast %33 : vector<64x128xf32> to vector<1x64x128xf32>
    tpu.vector_store %arg7[%c0_19, %c0_20, %c0_21], %36 {strides = array<i32>} : memref<1x64x128xf32, #tpu.memory_space<vmem>>, vector<1x64x128xf32>,
    return
  }
  func.func @transform_0(%arg0: i32) -> (i32, i32, i32) {
    %c0_i32 = arith.constant 0 : i32
    %c0_i32_0 = arith.constant 0 : i32
    %c0_i32_1 = arith.constant 0 : i32
    return %arg0, %c0_i32, %c0_i32_0 : i32, i32, i32
  }
  func.func @transform_1(%arg0: i32) -> (i32, i32, i32) {
    %c0_i32 = arith.constant 0 : i32
    %c0_i32_0 = arith.constant 0 : i32
    %c0_i32_1 = arith.constant 0 : i32
    return %arg0, %c0_i32, %c0_i32_0 : i32, i32, i32
  }
  func.func @transform_2(%arg0: i32) -> (i32, i32) {
    %c0_i32 = arith.constant 0 : i32
    %c0_i32_0 = arith.constant 0 : i32
    %c0_i32_1 = arith.constant 0 : i32
    return %c0_i32, %c0_i32_0 : i32, i32
  }
  func.func @transform_3(%arg0: i32) -> (i32, i32) {
    %c0_i32 = arith.constant 0 : i32
    %c0_i32_0 = arith.constant 0 : i32
    %c0_i32_1 = arith.constant 0 : i32
    return %c0_i32, %c0_i32_0 : i32, i32
  }
  func.func @transform_4(%arg0: i32) -> (i32, i32) {
    %c0_i32 = arith.constant 0 : i32
    %c0_i32_0 = arith.constant 0 : i32
    %c0_i32_1 = arith.constant 0 : i32
    return %c0_i32, %c0_i32_0 : i32, i32
  }
  func.func @transform_5(%arg0: i32) -> (i32, i32) {
    %c0_i32 = arith.constant 0 : i32
    %c0_i32_0 = arith.constant 0 : i32
    %c0_i32_1 = arith.constant 0 : i32
    return %c0_i32, %c0_i32_0 : i32, i32
  }
  func.func @transform_6(%arg0: i32) -> (i32, i32, i32) {
    %c0_i32 = arith.constant 0 : i32
    %c0_i32_0 = arith.constant 0 : i32
    %c0_i32_1 = arith.constant 0 : i32
    return %arg0, %c0_i32, %c0_i32_0 : i32, i32, i32
  }
}

</mosaic_0001>

<bundles_post_ra>
// kernel: scparalag_forward.1
= control target key start
LH: loop header
LB: loop body
LE: loop exit
PB: predicated region body
PF: predicated region fallthrough
CT: control target
= control target key end

     0   :  { %s1198_s21 = smov 0   ;;  %s1299_s0 = inlined_call_operand.vmem [shape: bf16[4,64,32], index: 0, kind: input, shape index: {}]   ;;  %s1300_s1 = inlined_call_operand.vmem [shape: bf16[4,128,64], index: 1, kind: input, shape index: {}]   ;;  %s1301_s2 = inlined_call_operand.vmem [shape: bf16[32,128], index: 2, kind: input, shape index: {}]   ;;  %s1302_s3 = inlined_call_operand.vmem [shape: f32[8,128], index: 3, kind: input, shape index: {}]   ;;  %s1303_s4 = inlined_call_operand.vmem [shape: bf16[64,64], index: 4, kind: input, shape index: {}]   ;;  %s1304_s5 = inlined_call_operand.vmem [shape: bf16[64,128], index: 5, kind: input, shape index: {}]   ;;  %s1305_s6 = inlined_call_operand.vmem [shape: f32[4,64,128], index: 6, kind: output, shape index: {}]  }
   0x1 LB: > { %s960_s22 = sadd.s32 4294967295, %s1160_s21   ;;  %p964_p0 = scmp.ge.s32.totalorder %s1160_s21, 1  ;;  %s1160_s21 = sphi %s1198_s21, %s16_s21  }
   0x2   : > { %p222_p1 = scmp.lt.s32.totalorder %s1160_s21, 5 }
   0x4   : > { %p223_p2 = pnand %p964_p0, %p222_p1 }
   0x5   : > { %v1132_v0 = vld [vmem:[%s1301_s2] sm:$0xff] (!%p223_p2)   ;;  %p257_p3 = scmp.lt.s32.totalorder (!%p223_p2), %s960_s22, 3  ;;  %v1133_v1 = vld [vmem:[%s1301_s2 + $0x8] sm:$0xff] (!%p223_p2)   ;;  %vm333_vm0 = vcmask (!%p223_p2), 261120   ;;  %vm455_vm1 = vcmask (!%p223_p2), 523264   ;;  %s1162_s11 = smov (!%p223_p2), 64   ;;  %v577_v35 = vlaneseq (!%p223_p2) }
   0x6   : > { %226 = sbr.rel (%p223_p2) target bundleno = 938 (0x3aa), region = 44  ;;  %1055 = vmatprep.subr.bf16.mxu0 (!%p223_p2), %v1132_v0  ;;  %v1146_v26 = vld [vmem:[%s1303_s4] sm:$0xff] (!%p223_p2)   ;;  %v1147_v27 = vld [vmem:[%s1303_s4 + $0x8] sm:$0xff] (!%p223_p2)   ;;  %v1148_v28 = vld [vmem:[%s1303_s4 + $0x10] sm:$0xff] (!%p223_p2)  }
   0x7   : > { %1056 = vmatpush3.bf16.msra.mxu0 (!%p223_p2), %v1132_v0  ;;  %v1149_v29 = vld [vmem:[%s1303_s4 + $0x18] sm:$0xff] (!%p223_p2)   ;;  %v1150_v30 = vld [vmem:[%s1304_s5] sm:$0xff] (!%p223_p2)   ;;  %v578_v40 = vand.u32 (!%p223_p2), 127, %v577_v35 }
   0x8   : > { %1057 = vmatprep.subr.bf16.mxu0 (!%p223_p2), %v1133_v1  ;;  %v997_v52 = vld [vmem:[%s1302_s3] ss:$0 sm:$0xff] (!%p223_p2) }
   0x9   : > { %vm579_vm2 = vcmp.lt.s32.totalorder (!%p223_p2), %v578_v40, 32 }
   0xb   : > { %1058 = vmatpush3.bf16.msra.mxu0 (!%p223_p2), %v1133_v1 }
   0xc   : > { %1091 = vmatprep.subr.bf16.mxu0 (!%p223_p2), %v1146_v26 }
   0xd   : > { %s1307_s22 = smov (!%p257_p3, %s960_s22), 3 }
   0xe   : > { %s1018_s27 = sshll.u32 %s1307_s22, 5  ;;  %s1019_s7 = sshll.u32 %s1307_s22, 6 }
   0xf   : > { %s261_s30 = scalar_lea.vmem %s1299_s0, %s1018_s27  ;;  %s1224_s10 = scalar_lea.vmem %s1300_s1, %s1019_s7 }
  0x10   : > { %v1134_v2 = vld [vmem:[%s261_s30] sm:$0xff]   ;;  %v1135_v3 = vld [vmem:[%s261_s30 + $0x8] sm:$0xff]   ;;  %v1136_v4 = vld [vmem:[%s261_s30 + $0x10] sm:$0xff]   ;;  %s271_s15 = scalar_lea.vmem %s1305_s6, %s1019_s7 }
  0x11   : > { %1059 = vmatprep.mubr.msk.bf16.mxu0 %vm333_vm0, %v1134_v2  ;;  %v1137_v5 = vld [vmem:[%s261_s30 + $0x18] sm:$0xff]   ;;  %v1138_v6 = vld [vmem:[%s1224_s10] sm:$0xff]   ;;  %v1139_v19 = vld [vmem:[%s1224_s10 + $0x8] sm:$0xff]  }
  0x12   : > { %1060 = vmatmul.mubr.msk.bf16.vlgmr.msra.gmra.mrb[0].mxu0 %vm333_vm0, %v1135_v3  ;;  %1075 = vmatprep.mubr.msk.bf16.mxu1 %vm455_vm1, %v1138_v6  ;;  %v1140_v20 = vld [vmem:[%s1224_s10 + $0x10] sm:$0xff]   ;;  %v1141_v21 = vld [vmem:[%s1224_s10 + $0x18] sm:$0xff]   ;;  %v1142_v22 = vld [vmem:[%s1224_s10 + $0x20] sm:$0xff]  }
  0x13   : > { %1063 = vmatprep.mubr.msk.bf16.mxu0 %vm333_vm0, %v1136_v4  ;;  %v1143_v23 = vld [vmem:[%s1224_s10 + $0x28] sm:$0xff]   ;;  %v1144_v24 = vld [vmem:[%s1224_s10 + $0x30] sm:$0xff]   ;;  %v1145_v25 = vld [vmem:[%s1224_s10 + $0x38] sm:$0xff]   ;;  %1092 = vmatpush3.bf16.msra.mxu0 %v1146_v26 }
  0x14   : > { %1093 = vmatprep.subr.bf16.mxu0 %v1147_v27 }
  0x17   : > { %1094 = vmatpush3.bf16.msra.mxu0 %v1147_v27 }
  0x18   : > { %1095 = vmatprep.subr.bf16.mxu0 %v1148_v28 }
  0x1a   : > { %1064 = vmatmul.mubr.msk.bf16.gmra.mrb[4].mxu0 %vm333_vm0, %v1137_v5 }
  0x1b   : > { %1096 = vmatpush3.bf16.msra.mxu0 %v1148_v28 }
  0x1c   : > { %1097 = vmatprep.subr.bf16.mxu0 %v1149_v29 }
  0x1f   : > { %1098 = vmatpush3.bf16.msra.mxu0 %v1149_v29 }
  0x20   : > { %1107 = vmatprep.subr.bf16.mxu0 %v1150_v30 }
  0xe5   : > { %v1061_v7 = vpop.f32.mrb[0].mxu0 }
  0xe6   : > { %603 = vrot.lane.b32.xlu1 %v1061_v7, %s1162_s11  ;;  %v380_v8 = vpop.f32.mrb[1].mxu0 }
  0xe7   : > { %599 = vrot.lane.b32.xlu0 %v380_v8, %s1162_s11  ;;  %v1062_v9 = vpop.f32.mrb[2].mxu0 }
  0xe8   : > { %v412_v10 = vpack.c.bf16 %v1062_v9, %v1061_v7  ;;  %v383_v11 = vpop.f32.mrb[3].mxu0 }
  0xe9   : > { %v411_v12 = vpack.c.bf16 %v383_v11, %v380_v8 }
  0xea   : > { %605 = vrot.lane.b32.xlu1 %v1062_v9, %s1162_s11  ;;  %v1151_v9 = vld [vmem:[%s1304_s5 + $0x8] sm:$0xff]  }
  0xeb   : > { %601 = vrot.lane.b32.xlu0 %v383_v11, %s1162_s11  ;;  %1067 = vmatprep.subr.bf16.mxu1 %v411_v12 }
  0xec   : > { %1068 = vmatpush3.bf16.msra.mxu1 %v411_v12 }
  0xed   : > { %v1065_v13 = vpop.f32.mrb[4].mxu0  ;;  %1069 = vmatprep.subr.bf16.mxu1 %v412_v10 }
  0xee   : > { %v396_v14 = vpop.f32.mrb[5].mxu0 }
  0xef   : > { %607 = vrot.lane.b32.xlu0 %v396_v14, %s1162_s11  ;;  %v1066_v15 = vpop.f32.mrb[6].mxu0 }
  0xf0   : > { %v414_v16 = vpack.c.bf16 %v1066_v15, %v1065_v13  ;;  %v399_v17 = vpop.f32.mrb[7].mxu0  ;;  %1070 = vmatpush3.bf16.msra.mxu1 %v412_v10 }
  0xf1   : > { %v413_v18 = vpack.c.bf16 %v399_v17, %v396_v14  ;;  %609 = vrot.lane.b32.xlu1 %v399_v17, %s1162_s11 }
  0xf3   : > { %611 = vrot.lane.b32.xlu0 %v1065_v13, %s1162_s11  ;;  %1071 = vmatprep.subr.bf16.mxu1 %v413_v18 }
  0xf4   : > { %1072 = vmatpush3.bf16.msra.mxu1 %v413_v18 }
  0xf5   : > { %613 = vrot.lane.b32.xlu1 %v1066_v15, %s1162_s11  ;;  %1073 = vmatprep.subr.bf16.mxu1 %v414_v16 }
  0xf8   : > { %1074 = vmatpush3.bf16.msra.mxu1 %v414_v16 }
  0xfb   : > { %1076 = vmatmul.mubr.msk.bf16.vlgmr.msra.gmra.mrb[0].mxu1 %vm455_vm1, %v1139_v19 }
  0xfc   : > { %1079 = vmatprep.mubr.msk.bf16.mxu1 %vm455_vm1, %v1140_v20 }
 0x103   : > { %1080 = vmatmul.mubr.msk.bf16.gmra.mrb[4].mxu1 %vm455_vm1, %v1141_v21 }
 0x104   : > { %1083 = vmatprep.mubr.msk.bf16.mxu1 %vm455_vm1, %v1142_v22 }
 0x10b   : > { %1084 = vmatmul.mubr.msk.bf16.gmra.mrb[8].mxu1 %vm455_vm1, %v1143_v23  ;;  %v1152_v23 = vld [vmem:[%s1304_s5 + $0x10] sm:$0xff]  }
 0x10c   : > { %1087 = vmatprep.mubr.msk.bf16.mxu1 %vm455_vm1, %v1144_v24  ;;  %v1153_v24 = vld [vmem:[%s1304_s5 + $0x18] sm:$0xff]  }
 0x113   : > { %1088 = vmatmul.mubr.msk.bf16.gmra.mrb[12].mxu1 %vm455_vm1, %v1145_v25  ;;  %v998_v25 = vld [vmem:[%s1302_s3 + $0x1] ss:$0 sm:$0xff] }
 0x158   : > { %v604_v41 = vpop.permute.xlu1 %603 }
 0x159   : > { %v600_v36 = vpop.permute.xlu0 %599 }
 0x15c   : > { %v606_v45 = vpop.permute.xlu1 %605 }
 0x15d   : > { %v602_v43 = vpop.permute.xlu0 %601 }
 0x161   : > { %v608_v51 = vpop.permute.xlu0 %607 }
 0x163   : > { %v610_v58 = vpop.permute.xlu1 %609 }
 0x165   : > { %v612_v2 = vpop.permute.xlu0 %611 }
 0x167   : > { %v614_v10 = vpop.permute.xlu1 %613 }
 0x1ce   : > { %v1077_v31 = vpop.f32.mrb[0].mxu1 }
 0x1cf   : > { %v514_v32 = vpop.f32.mrb[1].mxu1 }
 0x1d0   : > { %v1078_v33 = vpop.f32.mrb[2].mxu1 }
 0x1d1   : > { %v517_v34 = vpop.f32.mrb[3].mxu1 }
 0x1d6   : > { %v1081_v37 = vpop.f32.mrb[4].mxu1 }
 0x1d7   : > { %v530_v38 = vpop.f32.mrb[5].mxu1 }
 0x1d8   : > { %v1082_v39 = vpop.f32.mrb[6].mxu1 }
 0x1d9   : > { %v533_v42 = vpop.f32.mrb[7].mxu1 }
 0x1de   : > { %v1085_v44 = vpop.f32.mrb[8].mxu1 }
 0x1df   : > { %v582_v46 = vsel %vm579_vm2, %v1077_v31, %v1085_v44  ;;  %v546_v47 = vpop.f32.mrb[9].mxu1 }
 0x1e0   : > { %v625_v48 = vadd.f32 %v604_v41, %v582_v46  ;;  %v580_v49 = vsel %vm579_vm2, %v514_v32, %v546_v47  ;;  %v1086_v50 = vpop.f32.mrb[10].mxu1 }
 0x1e1   : > { %v623_v53 = vadd.f32 %v600_v36, %v580_v49  ;;  %v583_v54 = vsel %vm579_vm2, %v1078_v33, %v1086_v50  ;;  %v549_v55 = vpop.f32.mrb[11].mxu1 }
 0x1e2   : > { %v626_v56 = vadd.f32 %v606_v45, %v583_v54  ;;  %v581_v57 = vsel %vm579_vm2, %v517_v34, %v549_v55  ;;  %v637_v60 = vadd.f32 %v997_v52, %v625_v48  ;;  %v1007_v54 = vld [vmem:[%s1302_s3 + $0x2] ss:$0 sm:$0xff] }
 0x1e3   : > { %v624_v59 = vadd.f32 %v602_v43, %v581_v57  ;;  %v635_v62 = vadd.f32 %v997_v52, %v623_v53 }
 0x1e4   : > { %v638_v61 = vadd.f32 %v997_v52, %v626_v56 }
 0x1e5   : > { %v636_v63 = vadd.f32 %v997_v52, %v624_v59 }
 0x1e6   : > { %v644_v0 = vpack.c.bf16 %v638_v61, %v637_v60  ;;  %v1089_v1 = vpop.f32.mrb[12].mxu1 }
 0x1e7   : > { %v643_v3 = vpack.c.bf16 %v636_v63, %v635_v62  ;;  %v586_v4 = vsel %vm579_vm2, %v1081_v37, %v1089_v1  ;;  %v562_v5 = vpop.f32.mrb[13].mxu1 }
 0x1e8   : > { %v629_v6 = vadd.f32 %v612_v2, %v586_v4  ;;  %v584_v7 = vsel %vm579_vm2, %v530_v38, %v562_v5  ;;  %v1090_v8 = vpop.f32.mrb[14].mxu1 }
 0x1e9   : > { %v627_v11 = vadd.f32 %v608_v51, %v584_v7  ;;  %v587_v12 = vsel %vm579_vm2, %v1082_v39, %v1090_v8  ;;  %v565_v13 = vpop.f32.mrb[15].mxu1  ;;  %1099 = vmatprep.mubr.msk.bf16.mxu0 %vm455_vm1, %v643_v3 }
 0x1ea   : > { %v630_v14 = vadd.f32 %v614_v10, %v587_v12  ;;  %v585_v15 = vsel %vm579_vm2, %v533_v42, %v565_v13  ;;  %1100 = vmatmul.mubr.msk.bf16.vlgmr.msra.gmra.mrb[8].mxu0 %vm455_vm1, %v644_v0  ;;  %v641_v17 = vadd.f32 %v997_v52, %v629_v6 }
 0x1eb   : > { %v628_v16 = vadd.f32 %v610_v58, %v585_v15  ;;  %1108 = vmatpush3.bf16.msra.mxu0 %v1150_v30  ;;  %v639_v19 = vadd.f32 %v997_v52, %v627_v11 }
 0x1ec   : > { %v642_v18 = vadd.f32 %v997_v52, %v630_v14  ;;  %1109 = vmatprep.subr.bf16.mxu0 %v1151_v9 }
 0x1ed   : > { %v640_v20 = vadd.f32 %v997_v52, %v628_v16 }
 0x1ee   : > { %v646_v21 = vpack.c.bf16 %v642_v18, %v641_v17 }
 0x1ef   : > { %v645_v22 = vpack.c.bf16 %v640_v20, %v639_v19  ;;  %1110 = vmatpush3.bf16.msra.mxu0 %v1151_v9 }
 0x1f0   : > { %1111 = vmatprep.subr.bf16.mxu0 %v1152_v23 }
 0x1f1   : > { %1103 = vmatprep.mubr.msk.bf16.mxu0 %vm455_vm1, %v645_v22 }
 0x1f2   : > { %1104 = vmatmul.mubr.msk.bf16.gmra.mrb[12].mxu0 %vm455_vm1, %v646_v21 }
 0x1f3   : > { %1112 = vmatpush3.bf16.msra.mxu0 %v1152_v23 }
 0x1f4   : > { %1113 = vmatprep.subr.bf16.mxu0 %v1153_v24 }
 0x1f7   : > { %1114 = vmatpush3.bf16.msra.mxu0 %v1153_v24 }
 0x2bd   : > { %v1101_v26 = vpop.f32.mrb[8].mxu0 }
 0x2be   : > { %v738_v27 = vadd.f32 %v1101_v26, %v998_v25  ;;  %v729_v28 = vpop.f32.mrb[9].mxu0 }
 0x2bf   : > { %v730_v29 = vadd.f32 %v998_v25, %v729_v28  ;;  %v1102_v30 = vpop.f32.mrb[10].mxu0 }
 0x2c0   : > { %v741_v31 = vadd.f32 %v1102_v30, %v998_v25  ;;  %v732_v32 = vpop.f32.mrb[11].mxu0  ;;  %v762_v34 = vmax.f32 %v738_v27, 0.0 }
 0x2c1   : > { %v733_v33 = vadd.f32 %v998_v25, %v732_v32  ;;  %v760_v36 = vmax.f32 %v730_v29, 0.0 }
 0x2c2   : > { %v763_v35 = vmax.f32 %v741_v31, 0.0 }
 0x2c3   : > { %v761_v37 = vmax.f32 %v733_v33, 0.0 }
 0x2c4   : > { %v769_v38 = vpack.c.bf16 %v763_v35, %v762_v34 }
 0x2c5   : > { %v768_v39 = vpack.c.bf16 %v761_v37, %v760_v36  ;;  %v1105_v40 = vpop.f32.mrb[12].mxu0 }
 0x2c6   : > { %v754_v41 = vadd.f32 %v1105_v40, %v998_v25  ;;  %v745_v42 = vpop.f32.mrb[13].mxu0 }
 0x2c7   : > { %v746_v43 = vadd.f32 %v998_v25, %v745_v42  ;;  %v1106_v44 = vpop.f32.mrb[14].mxu0  ;;  %1115 = vmatprep.mubr.msk.bf16.mxu0 %vm455_vm1, %v768_v39 }
 0x2c8   : > { %v757_v45 = vadd.f32 %v1106_v44, %v998_v25  ;;  %v748_v46 = vpop.f32.mrb[15].mxu0  ;;  %1116 = vmatmul.mubr.msk.bf16.vlgmr.msra.gmra.mrb[16].mxu0 %vm455_vm1, %v769_v38  ;;  %v766_v48 = vmax.f32 %v754_v41, 0.0 }
 0x2c9   : > { %v749_v47 = vadd.f32 %v998_v25, %v748_v46  ;;  %v764_v50 = vmax.f32 %v746_v43, 0.0 }
 0x2ca   : > { %v767_v49 = vmax.f32 %v757_v45, 0.0 }
 0x2cb   : > { %v765_v51 = vmax.f32 %v749_v47, 0.0 }
 0x2cc   : > { %v771_v52 = vpack.c.bf16 %v767_v49, %v766_v48 }
 0x2cd   : > { %v770_v53 = vpack.c.bf16 %v765_v51, %v764_v50 }
 0x2cf   : > { %1119 = vmatprep.mubr.msk.bf16.mxu0 %vm455_vm1, %v770_v53 }
 0x2d0   : > { %1120 = vmatmul.mubr.msk.bf16.gmra.mrb[20].mxu0 %vm455_vm1, %v771_v52 }
 0x39b   : > { %v1117_v55 = vpop.f32.mrb[16].mxu0 }
 0x39c   : > { %v863_v56 = vadd.f32 %v1117_v55, %v1007_v54  ;;  %v854_v57 = vpop.f32.mrb[17].mxu0 }
 0x39d   : > { %v855_v58 = vadd.f32 %v1007_v54, %v854_v57  ;;  %v1118_v59 = vpop.f32.mrb[18].mxu0 }
 0x39e   : > { %887 = vst [vmem:[%s271_s15 + $0x10] sm:$0xff] %v863_v56  ;;  %v866_v60 = vadd.f32 %v1118_v59, %v1007_v54  ;;  %v857_v61 = vpop.f32.mrb[19].mxu0 }
 0x39f   : > { %885 = vst [vmem:[%s271_s15] sm:$0xff] %v855_v58  ;;  %v858_v62 = vadd.f32 %v1007_v54, %v857_v61 }
 0x3a0   : > { %888 = vst [vmem:[%s271_s15 + $0x18] sm:$0xff] %v866_v60 }
 0x3a1   : > { %886 = vst [vmem:[%s271_s15 + $0x8] sm:$0xff] %v858_v62 }
 0x3a3   : > { %v1121_v63 = vpop.f32.mrb[20].mxu0 }
 0x3a4   : > { %v879_v0 = vadd.f32 %v1121_v63, %v1007_v54  ;;  %v870_v1 = vpop.f32.mrb[21].mxu0 }
 0x3a5   : > { %v871_v2 = vadd.f32 %v1007_v54, %v870_v1  ;;  %v1122_v3 = vpop.f32.mrb[22].mxu0 }
 0x3a6   : > { %891 = vst [vmem:[%s271_s15 + $0x30] sm:$0xff] %v879_v0  ;;  %v882_v4 = vadd.f32 %v1122_v3, %v1007_v54  ;;  %v873_v5 = vpop.f32.mrb[23].mxu0 }
 0x3a7   : > { %889 = vst [vmem:[%s271_s15 + $0x20] sm:$0xff] %v871_v2  ;;  %v874_v6 = vadd.f32 %v1007_v54, %v873_v5 }
 0x3a8   : > { %892 = vst [vmem:[%s271_s15 + $0x38] sm:$0xff] %v882_v4 }
 0x3a9   : > { %890 = vst [vmem:[%s271_s15 + $0x28] sm:$0xff] %v874_v6 }
 0x3aa PF: > { %s16_s21 = sadd.s32 1, %s1160_s21  }
 0x3ab   : > { %p13_p4 = scmp.ge.s32.totalorder %s16_s21, 6  }
 0x3ad   :  { %15 = sbr.rel (!%p13_p4) target bundleno = 1 (0x1), region = 77 }

</bundles_post_ra>
